<compile_context>
chip_gen: v7x
topology: tpu7x:2x2x1
jax: 0.10.0
libtpu: 0.0.40
codegen_flags: <defaults>
</compile_context>

<pallas_src>
import jax
import jax.numpy as jnp
from jax.experimental import pallas as pl
from jax.experimental.pallas import tpu as pltpu

IN_FEATURES = 10
OUT_FEATURES = 10


def _round_up(x, m):
    return (x + m - 1) // m * m


def _cdiv(a, b):
    return (a + b - 1) // b


def g_m2_kernel(x_ref, w_ref, b_ref, o_ref):
    # One (TB, 10) x (10, 10) matmul + bias add per grid step; weight/bias VMEM-resident.
    o_ref[...] = (
        jnp.dot(x_ref[...], w_ref[...], preferred_element_type=jnp.float32)
        + b_ref[...]
    ).astype(o_ref.dtype)


def g_m2_forward(x, w, b, *, block_b=2048, force_pallas=False):
    """x: [B, 10] f32. w: [10, 10] stored [in, out]. b: [10] f32. Returns [B, 10]."""
    assert block_b % 8 == 0, "block_b must be a multiple of 8 (sublane tiling)"
    B, f_in = x.shape
    f_out = w.shape[1]

    # Small/moderate batches: the pallas_call launch overhead dwarfs ~100 ns of work;
    # let XLA fuse a plain matmul instead (Pallas path can still be forced).
    if not force_pallas and B < 1024:
        return x @ w + b[None, :]

    # Pad batch only to the tile boundary; pick TB adaptively so the total padding
    # waste is < 8 rows per block (never round_up(B, TB)).
    B8 = _round_up(B, 8)
    n_blocks = max(1, _cdiv(B8, block_b))
    TB = _round_up(_cdiv(B8, n_blocks), 8)
    B_pad = n_blocks * TB

    if B_pad != B:
        x_p = jnp.zeros((B_pad, f_in), x.dtype).at[:B].set(x)
    else:
        x_p = x

    b2 = b.reshape(1, f_out)

    # Real cost: weight/bias counted once (VMEM-resident), x read + out written once.
    cost = pl.CostEstimate(
        flops=2 * B_pad * f_in * f_out,
        transcendentals=0,
        bytes_accessed=4 * (B_pad * f_in + f_in * f_out + f_out + B_pad * f_out),
    )

    out = pl.pallas_call(
        g_m2_kernel,
        out_shape=jax.ShapeDtypeStruct((B_pad, f_out), jnp.float32),
        grid=(n_blocks,),
        in_specs=[
            pl.BlockSpec((TB, f_in), lambda i: (i, 0)),      # x tile, pipelined over batch
            pl.BlockSpec((f_in, f_out), lambda i: (0, 0)),   # weight, VMEM-resident
            pl.BlockSpec((1, f_out), lambda i: (0, 0)),      # bias, VMEM-resident
        ],
        out_specs=pl.BlockSpec((TB, f_out), lambda i: (i, 0)),
        compiler_params=pltpu.CompilerParams(
            dimension_semantics=("parallel",),
        ),
        cost_estimate=cost,
    )(x_p, w, b2)

    return out[:B] if B_pad != B else out


def init_params(key):
    """Deterministic init mimicking nn.Linear default (uniform +/- 1/sqrt(fan_in))."""
    kw, kb = jax.random.split(key)
    bound = 1.0 / jnp.sqrt(jnp.float32(IN_FEATURES))
    # stored as [in, out] so the kernel computes x @ W + b
    w = jax.random.uniform(kw, (IN_FEATURES, OUT_FEATURES), jnp.float32,
                           minval=-bound, maxval=bound)
    b = jax.random.uniform(kb, (OUT_FEATURES,), jnp.float32,
                           minval=-bound, maxval=bound)
    return w, b


def g_m2_reference(x, w, b):
    # G_M2.forward applies only the Linear layer (self.relu is defined but unused).
    return x @ w + b[None, :]


if __name__ == "__main__":
    key = jax.random.PRNGKey(0)
    kx, kx2, kp = jax.random.split(key, 3)
    w, b = init_params(kp)

    # Small-batch check (Pallas path forced so the kernel actually runs): grid = 1, TB = 8.
    B1 = 8
    x1 = jax.random.normal(kx, (B1, IN_FEATURES), jnp.float32)
    out1 = jax.block_until_ready(g_m2_forward(x1, w, b, force_pallas=True))
    ref1 = g_m2_reference(x1, w, b)
    assert out1.shape == (B1, OUT_FEATURES), out1.shape
    assert jnp.allclose(out1, ref1, atol=1e-4, rtol=1e-4), "mismatch vs reference (B=8)"

    # Multi-block check: B not a multiple of 8, grid > 1 (exercises padding + tiling).
    B2 = 300
    x2 = jax.random.normal(kx2, (B2, IN_FEATURES), jnp.float32)
    out2 = jax.block_until_ready(g_m2_forward(x2, w, b, block_b=128, force_pallas=True))
    ref2 = g_m2_reference(x2, w, b)
    assert out2.shape == (B2, OUT_FEATURES), out2.shape
    assert jnp.allclose(out2, ref2, atol=1e-4, rtol=1e-4), "mismatch vs reference (B=300)"

    print("KERNEL_OK")
</pallas_src>

<mosaic_0001>
module attributes {stable_mosaic.version = 11 : i64} {
  func.func @g_m2_kernel(%arg0: i32, %arg1: memref<8x10xf32, #tpu.memory_space<vmem>>, %arg2: memref<10x10xf32, #tpu.memory_space<vmem>>, %arg3: memref<1x10xf32, #tpu.memory_space<vmem>>, %arg4: memref<8x10xf32, #tpu.memory_space<vmem>>) attributes {dimension_semantics = [#tpu.dimension_semantics<parallel>], iteration_bounds = array<i64: 1>, scalar_prefetch = 0 : i64, scratch_operands = 0 : i64, tpu.core_type = #tpu.core_type<tc>, window_params = [{transform_indices = @transform_0, window_bounds = array<i64: 8, 10>}, {pipeline_mode = #tpu.pipeline_mode<synchronous>, transform_indices = @transform_1, window_bounds = array<i64: 10, 10>}, {pipeline_mode = #tpu.pipeline_mode<synchronous>, transform_indices = @transform_2, window_bounds = array<i64: 1, 10>}, {transform_indices = @transform_3, window_bounds = array<i64: 8, 10>}]} {
    %c0 = arith.constant 0 : index
    %c0_0 = arith.constant 0 : index
    %0 = vector.load %arg1[%c0, %c0_0] : memref<8x10xf32, #tpu.memory_space<vmem>>, vector<8x10xf32>
    %c0_1 = arith.constant 0 : index
    %c0_2 = arith.constant 0 : index
    %1 = vector.load %arg2[%c0_1, %c0_2] : memref<10x10xf32, #tpu.memory_space<vmem>>, vector<10x10xf32>
    %cst = arith.constant dense<0.000000e+00> : vector<8x10xf32>
    %2 = tpu.matmul %0, %1, %cst {dimension_numbers = #tpu.dot_dimension_numbers<[1], [0], [0], [1], [0, 0, 1, 1], [], []>} : vector<8x10xf32>, vector<10x10xf32>, vector<8x10xf32> -> vector<8x10xf32>
    %c0_3 = arith.constant 0 : index
    %c0_4 = arith.constant 0 : index
    %3 = vector.load %arg3[%c0_3, %c0_4] : memref<1x10xf32, #tpu.memory_space<vmem>>, vector<1x10xf32>
    %4 = vector.broadcast %3 : vector<1x10xf32> to vector<8x10xf32>
    %5 = arith.addf %2, %4 : vector<8x10xf32>
    %c0_5 = arith.constant 0 : index
    %c0_6 = arith.constant 0 : index
    %6 = vector.load %arg4[%c0_5, %c0_6] : memref<8x10xf32, #tpu.memory_space<vmem>>, vector<8x10xf32>
    tpu.vector_store %arg4[%c0_5, %c0_6], %5 {strides = array<i32>} : memref<8x10xf32, #tpu.memory_space<vmem>>, vector<8x10xf32>,
    return
  }
  func.func @transform_0(%arg0: i32) -> (i32, i32) {
    %c0_i32 = arith.constant 0 : i32
    %c0_i32_0 = arith.constant 0 : i32
    return %arg0, %c0_i32 : i32, i32
  }
  func.func @transform_1(%arg0: i32) -> (i32, i32) {
    %c0_i32 = arith.constant 0 : i32
    %c0_i32_0 = arith.constant 0 : i32
    %c0_i32_1 = arith.constant 0 : i32
    return %c0_i32, %c0_i32_0 : i32, i32
  }
  func.func @transform_2(%arg0: i32) -> (i32, i32) {
    %c0_i32 = arith.constant 0 : i32
    %c0_i32_0 = arith.constant 0 : i32
    %c0_i32_1 = arith.constant 0 : i32
    return %c0_i32, %c0_i32_0 : i32, i32
  }
  func.func @transform_3(%arg0: i32) -> (i32, i32) {
    %c0_i32 = arith.constant 0 : i32
    %c0_i32_0 = arith.constant 0 : i32
    return %arg0, %c0_i32 : i32, i32
  }
}

</mosaic_0001>

<bundles_post_ra>
// kernel: tpu_custom_call.1
= control target key start
LH: loop header
LB: loop body
LE: loop exit
PB: predicated region body
PF: predicated region fallthrough
CT: control target
= control target key end

     0   :  { %8 = vsyncpa [#allocation3], 0  ;;  %s319_s0 = inlined_call_operand.hbm [shape: f32[8,10], index: 0, kind: input, shape index: {}]   ;;  %s320_s1 = inlined_call_operand.hbm [shape: f32[10,10], index: 1, kind: input, shape index: {}]   ;;  %s321_s2 = inlined_call_operand.vmem [shape: f32[1,10], index: 2, kind: input, shape index: {}]   ;;  %s322_s3 = inlined_call_operand.hbm [shape: f32[8,10], index: 3, kind: output, shape index: {}]  }
   0x1   :  { %9 = vsyncpa [#allocation6], 0 }
   0x2   :  { %10 = vsyncpa [#allocation4], 0  ;;  %s244_s12 = smov [#allocation2]   ;;  %s245_s14 = smov [#allocation5]  }
   0x3   :  { %s17_s13 = sshll.u32 %s244_s12, 4  ;;  %s26_s15 = sshll.u32 %s245_s14, 4  ;;  %s18_s13 = int_to_ptr.vmem [resolvable:$true] %s17_s13  ;;  %s273_s15 = int_to_ptr.vmem [resolvable:$true] %s26_s15 }
   0x4   :  { %s172_s18 = scalar_lea.hbm %s319_s0, 128 }
   0x5   :  { %p173_p0 = scmp.ne.s32.totalorder %s319_s0, %s172_s18  ;;  %p176_p1 = scmp.lt.u32.totalorder %s172_s18, %s319_s0 }
   0x7   :  { %p178_p2 = pnand %p176_p1, %p173_p0 }
   0x9   :  { %181 = shalt.err (!%p178_p2)
}
   0xa   :  { %s182_s23 = scalar_lea.vmem %s18_s13, 128  ;;  %p187_p4 = scmp.lt.s32.totalorder %s18_s13, %s18_s13 }
   0xb   :  { %p183_p3 = scmp.ne.s32.totalorder %s18_s13, %s182_s23  ;;  %p188_p5 = scmp.lt.s32.totalorder %s182_s23, %s182_s23 }
   0xd   :  { %p189_p6 = por %p188_p5, %p187_p4 }
   0xf   :  { %p190_p7 = pnand %p189_p6, %p183_p3 }
  0x11   :  { %193 = shalt.err (!%p190_p7)
}
  0x12   :  { %20 = dma.hbm_to_vmem [thread:$0]  %s319_s0, 128, %s18_s13, [#allocation3]  }
  0x13   :  { %s194_s28 = scalar_lea.hbm %s320_s1, 256 }
  0x14   :  { %p195_p8 = scmp.ne.s32.totalorder %s320_s1, %s194_s28  ;;  %p198_p9 = scmp.lt.u32.totalorder %s194_s28, %s320_s1 }
  0x16   :  { %p200_p10 = pnand %p198_p9, %p195_p8 }
  0x18   :  { %203 = shalt.err (!%p200_p10)
}
  0x19   :  { %s204_s6 = scalar_lea.vmem %s273_s15, 256  ;;  %p209_p12 = scmp.lt.s32.totalorder %s273_s15, %s273_s15 }
  0x1a   :  { %p205_p11 = scmp.ne.s32.totalorder %s273_s15, %s204_s6  ;;  %p210_p13 = scmp.lt.s32.totalorder %s204_s6, %s204_s6 }
  0x1c   :  { %p211_p0 = por %p210_p13, %p209_p12 }
  0x1e   :  { %p212_p1 = pnand %p211_p0, %p205_p11 }
  0x20   :  { %215 = shalt.err (!%p212_p1)
}
  0x21   :  { %s246_s0 = smov 128   ;;  %s247_s7 = smov 8  }
  0x22   :  { %32 = dma.hbm_to_vmem [thread:$0]  %s320_s1, 256, %s273_s15, [#allocation6], %s246_s0, %s246_s0, %s247_s7  }
  0x23   :  { %238 = dma.done.wait [#allocation3], 128  }
  0x24   :  { %239 = vsyncadd [#allocation3], 4294967168 }
  0x25   :  { %240 = dma.done.wait [#allocation6], 256  }
  0x26   :  { %241 = vsyncadd [#allocation6], 4294967040  ;;  %v248_v0 = vmov 0.0|0.0   ;;  %vm249_vm0 = vmmov 0   ;;  %v250_v1 = vmov 0.0   ;;  %vm55_vm1 = vcmask 1041408  }
  0x27   :  { %159 = vmatprep.subr.bf16.mxu0 %v248_v0  ;;  %156 = vmatprep.mubr.msk.f32.mxu0 %vm249_vm0, %v250_v1  ;;  %v42_v2 = vld [vmem:[#allocation5] sm:$0xff]  ;;  %v43_v3 = vld [vmem:[#allocation5 + $0x8] sm:$0x3]  ;;  %vm251_vm2 = vmmov 1   ;;  %v41_v5 = vld [vmem:[#allocation2] sm:$0xff]  ;;  %vm51_vm4 = vcmask 80896  }
  0x28   :  { %vm161_vm3 = vmpackc.low %vm55_vm1, %vm251_vm2  ;;  %v160_v4 = vpack.c.bf16 %v43_v3, %v42_v2  ;;  %v146_v6 = vld [vmem:[%s321_s2] ss:$0 sm:$0xff]  ;;  %s252_s11 = smov [#allocation7]  }
  0x29   :  { %s136_s12 = sshll.u32 %s252_s11, 4  ;;  %s137_s12 = int_to_ptr.vmem [resolvable:$true] %s136_s12 }
  0x2a   :  { %162 = vmatpush3.bf16.msk.msra.mxu0 %vm161_vm3, %v160_v4  ;;  %s216_s13 = scalar_lea.vmem %s137_s12, 128  ;;  %p221_p3 = scmp.lt.s32.totalorder %s137_s12, %s137_s12 }
  0x2b   :  { %p217_p2 = scmp.ne.s32.totalorder %s137_s12, %s216_s13  ;;  %p222_p4 = scmp.lt.s32.totalorder %s216_s13, %s216_s13 }
  0x2d   :  { %157 = vmatmul.mubr.msk.f32.vlgmr.msra.gmra.mrb[0].mxu0 %vm51_vm4, %v41_v5  ;;  %p223_p5 = por %p222_p4, %p221_p3 }
  0x2f   :  { %p224_p6 = pnand %p223_p5, %p217_p2 }
 0x100   :  { %v125_v7 = vpop.f32.mrb[0].mxu0 }
 0x101   :  { %v126_v8 = vadd.f32 %v146_v6, %v125_v7  ;;  %v158_v9 = vpop.f32.mrb[1].mxu0 }
 0x103   :  { %129 = vst.msk [vmem:[#allocation7] sm:$0xff] %vm51_vm4, %v126_v8 }
 0x104   :  { %227 = shalt.err (!%p224_p6)
}
 0x105   :  { %s228_s16 = scalar_lea.hbm %s322_s3, 128 }
 0x106   :  { %p229_p7 = scmp.ne.s32.totalorder %s322_s3, %s228_s16  ;;  %p232_p8 = scmp.lt.u32.totalorder %s228_s16, %s322_s3 }
 0x108   :  { %p234_p9 = pnand %p232_p8, %p229_p7 }
 0x10a   :  { %237 = shalt.err (!%p234_p9)
}
 0x10b   :  { %139 = dma.vmem_to_hbm [thread:$0]  %s137_s12, 128, %s322_s3, [#allocation4]  }
 0x10c   :  { %242 = dma.done.wait [#allocation4], 128  }
 0x10d   :  { %243 = vsyncadd [#allocation4], 4294967168 }
 0x10e   :  { %143 = vsyncpa [#allocation3], 1 }
 0x10f   :  { %144 = vsyncpa [#allocation6], 1 }
 0x110   :  { %145 = vsyncpa [#allocation4], 1 }

</bundles_post_ra>
